<compile_context>
chip_gen: v5e
topology: v5e:2x2
jax: 0.10.0
libtpu: 0.0.40
codegen_flags: <defaults>
</compile_context>

<pallas_src>
import functools
import math

import jax
import jax.numpy as jnp
from jax.experimental import pallas as pl
from jax.experimental.pallas import tpu as pltpu

_MIB = 1 << 20


# ---------------------------------------------------------------------------
# Kernel 1: label-context gathering.
#   ctx^T[b] (Cin, K) = sum over spatial tiles of  sfeat_tile (Cin, tn) @ probT_tile (tn, K)
# Grid: (split, batch, spatial-tile); reduction axis last ("arbitrary"), the
# f32 output block is the accumulator (same index across the reduction axis).
# ---------------------------------------------------------------------------
def _context_kernel(sfeat_ref, probT_ref, ctxT_ref, *, compute_dtype):
    @pl.when(pl.program_id(2) == 0)
    def _():
        ctxT_ref[...] = jnp.zeros_like(ctxT_ref)

    sfeat = sfeat_ref[0].astype(compute_dtype)           # (Cin, tile_n)
    probT = probT_ref[0]                                  # (tile_n, K)
    ctxT_ref[0, 0] += jnp.dot(sfeat, probT,
                              preferred_element_type=jnp.float32)


# ---------------------------------------------------------------------------
# Kernel 2: key / value projections from the gathered context (tiny, per batch).
# Sums the split partial contexts in f32 and applies the folded ConvBNReLU
# affines (kept in f32 for accuracy; outputs cast to the compute dtype).
# ---------------------------------------------------------------------------
def _kv_project_kernel(ctxT_ref, k1wT_ref, k1b_ref, k2wT_ref, k2b_ref,
                       vwT_ref, vb_ref, key_ref, valueT_ref, *, num_splits):
    f32 = jnp.float32
    ctxT = ctxT_ref[0, 0]                                 # (Cin, K) f32
    for s in range(1, num_splits):                        # static unroll
        ctxT = ctxT + ctxT_ref[s, 0]

    h1T = jnp.maximum(jnp.dot(k1wT_ref[...], ctxT, preferred_element_type=f32)
                      + k1b_ref[...], 0.0)                # (Cout, K)
    keyT = jnp.maximum(jnp.dot(k2wT_ref[...], h1T, preferred_element_type=f32)
                       + k2b_ref[...], 0.0)               # (Cout, K)
    valT = jnp.maximum(jnp.dot(vwT_ref[...], ctxT, preferred_element_type=f32)
                       + vb_ref[...], 0.0)                # (Cout, K)

    key_ref[0] = keyT.T.astype(key_ref.dtype)             # (K, Cout)
    valueT_ref[0] = valT.astype(valueT_ref.dtype)         # (Cout, K)


# ---------------------------------------------------------------------------
# Kernel 3: query projection + attention, tiled over N, transposed dataflow.
# Everything stays channels-major so N (multiple of 128) is the lane axis and
# the output is written lane-dense as (B, Cout, N) -- already NCHW-flattened.
# ---------------------------------------------------------------------------
def _attention_kernel(tfeat_ref, key_ref, valueT_ref,
                      q1wT_ref, q1bT_ref, q2wT_ref, q2bT_ref, out_ref,
                      *, compute_dtype):
    f32 = jnp.float32
    cd = compute_dtype
    x = tfeat_ref[0].astype(cd)                           # (Cin, tile_n)

    # query_project (transposed): q^T = relu(W2 @ relu(W1 @ x + b1) + b2)
    # 1/sqrt(Cout) already folded into W2/b2 (positive scale commutes w/ ReLU).
    q1 = jnp.maximum(jnp.dot(q1wT_ref[...], x, preferred_element_type=f32)
                     + q1bT_ref[...], 0.0).astype(cd)     # (Cout, tile_n)
    qT = jnp.maximum(jnp.dot(q2wT_ref[...], q1, preferred_element_type=f32)
                     + q2bT_ref[...], 0.0).astype(cd)     # (Cout, tile_n)

    simT = jnp.dot(key_ref[0], qT, preferred_element_type=f32)   # (K, tile_n)

    # softmax over K (sublane axis), statistics in f32
    simT = simT - jnp.max(simT, axis=0, keepdims=True)
    p = jnp.exp(simT)
    p = p * pl.reciprocal(jnp.sum(p, axis=0, keepdims=True), approx=True)

    # out^T = value^T @ p  -> (Cout, tile_n): lane-dense store.
    outT = jnp.dot(valueT_ref[0], p.astype(cd), preferred_element_type=f32)
    out_ref[0] = outT.astype(out_ref.dtype)


# ---------------------------------------------------------------------------
# Wrapper helpers
# ---------------------------------------------------------------------------
def _round_up(x, m):
    return ((x + m - 1) // m) * m


def _vmem_budget_and_tile_cap():
    """Per-generation VMEM budget for the pipeline and a tile_n cap."""
    try:
        cap = int(pltpu.get_tpu_info().vmem_capacity_bytes)
    except Exception:
        cap = 64 * _MIB                       # conservative (v7x-sized) fallback
    if cap >= 100 * _MIB:                     # v5e / v6e: 128 MiB physical
        return 96 * _MIB, 2048
    return max(cap // 2, 16 * _MIB), 1024     # v7x: 64 MiB per TensorCore


def _choose_tile_n(N, vmem_budget, Cin, Cout, K, in_bytes, out_bytes, tile_cap):
    """Largest 128-multiple tile (256-multiples preferred via the ladder) that
    fits the stage-2 working set in the VMEM budget, preferring exact divisors
    of N and otherwise minimizing zero-padding waste."""
    per_col = (2 * Cin * in_bytes + 2 * Cin     # dbl-buffered input tile + bf16 copy
               + 2 * Cout * out_bytes           # dbl-buffered output tile
               + 12 * Cout + 8 * K)             # f32 temporaries q1/qT/simT/p/outT
    resident = 4 * (Cout * Cin + Cout * Cout) + 8 * K * Cout + 4096
    budget = max(vmem_budget - resident - 2 * _MIB, per_col * 128)
    max_cols = budget // per_col
    ladder = [t for t in (2048, 1024, 512, 256, 128)
              if t <= tile_cap and t <= max_cols]
    if not ladder:
        ladder = [128]
    exact = [t for t in ladder if N % t == 0]
    if exact:
        return exact[0]                          # largest exact divisor
    return min(ladder, key=lambda t: (_round_up(N, t) - N, -t))


# ---------------------------------------------------------------------------
# Main wrapper
# ---------------------------------------------------------------------------
def label_context_attention(target_feats, source_feats,
                            target_aux_prob, source_aux_prob, params,
                            context_type="tlabel", tile_n=None,
                            compute_dtype=jnp.bfloat16, out_dtype=jnp.bfloat16):
    assert context_type in ("tlabel", "slabel")
    B, Cin, H, W = target_feats.shape
    N = H * W
    prob = target_aux_prob if context_type == "tlabel" else source_aux_prob
    K = prob.shape[1]
    Cout = params["q1wT"].shape[0]
    cd = compute_dtype
    f32 = jnp.float32
    in_bytes = jnp.dtype(target_feats.dtype).itemsize
    out_bytes = jnp.dtype(out_dtype).itemsize
    cd_bytes = jnp.dtype(cd).itemsize

    vmem_budget, tile_cap = _vmem_budget_and_tile_cap()
    if tile_n is None:
        tile_n = _choose_tile_n(N, vmem_budget, Cin, Cout, K,
                                in_bytes, out_bytes, tile_cap)
    assert tile_n % 128 == 0, "tile_n must be a multiple of 128"

    n_pad = _round_up(N, tile_n)
    pad = n_pad - N

    # (B, C, H, W) -> (B, C, N): channels-major, pure reshape, no dtype pre-pass.
    tfeat = target_feats.reshape(B, Cin, N)
    sfeat = source_feats.reshape(B, Cin, N)
    # Only wrapper-side data movement: transpose(+cast) of the SMALL prob tensor
    # so the stage-1 contraction is MXU-canonical.
    probT = jnp.swapaxes(prob, 1, 2).astype(cd)            # (B, N, K)

    if pad:
        tfeat = jnp.pad(tfeat, ((0, 0), (0, 0), (0, pad)))
        sfeat = jnp.pad(sfeat, ((0, 0), (0, 0), (0, pad)))
        probT = jnp.pad(probT, ((0, 0), (0, pad), (0, 0)))

    nt = n_pad // tile_n
    # Split the stage-1 spatial reduction across two partials so both v7x
    # TensorCores get work when the batch alone can't fill them (harmless on
    # single-core chips: one tiny extra HBM round-trip of ctx).
    num_splits = 2 if (B <= 2 and nt >= 2 and nt % 2 == 0) else 1
    ntp = nt // num_splits

    # --- weights (folded Conv+BN affines) -------------------------------------
    scale = 1.0 / math.sqrt(Cout)
    q1wT = params["q1wT"].astype(cd)                       # (Cout, Cin)
    q2wT = (params["q2wT"] * scale).astype(cd)             # attention scale folded
    q1bT = params["q1bT"].astype(f32)                      # (Cout, 1)
    q2bT = (params["q2bT"] * scale).astype(f32)
    k1wT = params["k1wT"].astype(f32)
    k2wT = params["k2wT"].astype(f32)
    vwT = params["vwT"].astype(f32)
    k1b = params["k1b"].astype(f32)
    k2b = params["k2b"].astype(f32)
    vb = params["vb"].astype(f32)

    vmem_limit = int(vmem_budget)

    # ---- Stage 1: partial contexts ctx^T (num_splits, B, Cin, K) -------------
    ctx_cost = pl.CostEstimate(
        flops=int(2 * B * n_pad * K * Cin),
        transcendentals=0,
        bytes_accessed=int(B * n_pad * (Cin * in_bytes + K * cd_bytes)
                           + num_splits * B * Cin * K * 4))
    ctxT = pl.pallas_call(
        functools.partial(_context_kernel, compute_dtype=cd),
        out_shape=jax.ShapeDtypeStruct((num_splits, B, Cin, K), f32),
        grid=(num_splits, B, ntp),
        in_specs=[
            pl.BlockSpec((1, Cin, tile_n), lambda s, b, j: (b, 0, s * ntp + j)),
            pl.BlockSpec((1, tile_n, K), lambda s, b, j: (b, s * ntp + j, 0)),
        ],
        out_specs=pl.BlockSpec((1, 1, Cin, K), lambda s, b, j: (s, b, 0, 0)),
        compiler_params=pltpu.CompilerParams(
            dimension_semantics=("parallel", "parallel", "arbitrary"),
            vmem_limit_bytes=vmem_limit),
        cost_estimate=ctx_cost,
    )(sfeat, probT)

    # ---- Stage 1b: key (B, K, Cout) and value^T (B, Cout, K) ------------------
    const2 = lambda b: (0, 0)
    key, valueT = pl.pallas_call(
        functools.partial(_kv_project_kernel, num_splits=num_splits),
        out_shape=(jax.ShapeDtypeStruct((B, K, Cout), cd),
                   jax.ShapeDtypeStruct((B, Cout, K), cd)),
        grid=(B,),
        in_specs=[
            pl.BlockSpec((num_splits, 1, Cin, K), lambda b: (0, b, 0, 0)),
            pl.BlockSpec((Cout, Cin), const2), pl.BlockSpec((Cout, 1), const2),
            pl.BlockSpec((Cout, Cout), const2), pl.BlockSpec((Cout, 1), const2),
            pl.BlockSpec((Cout, Cin), const2), pl.BlockSpec((Cout, 1), const2),
        ],
        out_specs=(pl.BlockSpec((1, K, Cout), lambda b: (b, 0, 0)),
                   pl.BlockSpec((1, Cout, K), lambda b: (b, 0, 0))),
        compiler_params=pltpu.CompilerParams(
            dimension_semantics=("parallel",),
            vmem_limit_bytes=vmem_limit),
    )(ctxT, k1wT, k1b, k2wT, k2b, vwT, vb)

    # ---- Stage 2: query projection + attention, tiled over N -----------------
    att_cost = pl.CostEstimate(
        flops=int(2 * B * n_pad * Cout * (Cin + Cout + 2 * K)),
        transcendentals=int(B * n_pad * (K + 1)),
        bytes_accessed=int(B * n_pad * (Cin * in_bytes + Cout * out_bytes)
                           + cd_bytes * (Cout * Cin + Cout * Cout)
                           + 2 * B * K * Cout * cd_bytes))
    const2b = lambda b, j: (0, 0)
    out = pl.pallas_call(
        functools.partial(_attention_kernel, compute_dtype=cd),
        out_shape=jax.ShapeDtypeStruct((B, Cout, n_pad), out_dtype),
        grid=(B, nt),
        in_specs=[
            pl.BlockSpec((1, Cin, tile_n), lambda b, j: (b, 0, j)),   # tfeat
            pl.BlockSpec((1, K, Cout), lambda b, j: (b, 0, 0)),       # key
            pl.BlockSpec((1, Cout, K), lambda b, j: (b, 0, 0)),       # value^T
            pl.BlockSpec((Cout, Cin), const2b), pl.BlockSpec((Cout, 1), const2b),
            pl.BlockSpec((Cout, Cout), const2b), pl.BlockSpec((Cout, 1), const2b),
        ],
        out_specs=pl.BlockSpec((1, Cout, tile_n), lambda b, j: (b, 0, j)),
        compiler_params=pltpu.CompilerParams(
            dimension_semantics=("parallel", "parallel"),
            vmem_limit_bytes=vmem_limit),
        cost_estimate=att_cost,
    )(tfeat, key, valueT, q1wT, q1bT, q2wT, q2bT)

    if pad:
        out = out[:, :, :N]
    return out.reshape(B, Cout, H, W)     # pure reshape, no transpose needed


# ---------------------------------------------------------------------------
# Parameter construction (Xavier 1x1 conv, zero bias, eval-mode BN folded).
# All weights stored Cout-major ("T") with column biases for the transposed
# dataflow.
# ---------------------------------------------------------------------------
def make_params(key, in_channels, out_channels, bn_eps=1e-5):
    bn_scale = 1.0 / math.sqrt(1.0 + bn_eps)   # gamma=1, beta=0, mean=0, var=1

    def xavier_t(k, cin, cout):
        bound = math.sqrt(6.0 / (cin + cout))
        w = jax.random.uniform(k, (cin, cout), jnp.float32, -bound, bound)
        return (w * bn_scale).T                 # stored (Cout, Cin)

    ks = jax.random.split(key, 5)
    zcol = jnp.zeros((out_channels, 1), jnp.float32)
    return dict(
        q1wT=xavier_t(ks[0], in_channels, out_channels), q1bT=zcol,
        q2wT=xavier_t(ks[1], out_channels, out_channels), q2bT=zcol,
        k1wT=xavier_t(ks[2], in_channels, out_channels), k1b=zcol,
        k2wT=xavier_t(ks[3], out_channels, out_channels), k2b=zcol,
        vwT=xavier_t(ks[4], in_channels, out_channels), vb=zcol,
    )


def reference(tfeats, sfeats, prob, params):
    """Pure-JAX f32 reference mirroring the PyTorch forward (eval-mode BN folded)."""
    B, Cin, H, W = tfeats.shape
    N = H * W
    lin = lambda x, wT, b: jax.nn.relu(x @ wT.T + b.T)
    sf = jnp.swapaxes(sfeats.reshape(B, Cin, N), 1, 2)            # (B, N, Cin)
    ctx = jnp.einsum("bkn,bnc->bkc", prob, sf)                    # (B, K, Cin)
    key = lin(lin(ctx, params["k1wT"], params["k1b"]), params["k2wT"], params["k2b"])
    value = lin(ctx, params["vwT"], params["vb"])                 # (B, K, Cout)
    tf = jnp.swapaxes(tfeats.reshape(B, Cin, N), 1, 2)            # (B, N, Cin)
    q = lin(lin(tf, params["q1wT"], params["q1bT"]), params["q2wT"], params["q2bT"])
    sim = jnp.einsum("bnc,bkc->bnk", q, key) / math.sqrt(q.shape[-1])
    p = jax.nn.softmax(sim, axis=-1)
    out = jnp.einsum("bnk,bkc->bnc", p, value)
    return jnp.swapaxes(out, 1, 2).reshape(B, -1, H, W)


if __name__ == "__main__":
    B, Cin, Cout, H, W, K = 2, 4, 8, 32, 32, 8
    N = H * W

    root = jax.random.PRNGKey(0)
    kp, k1, k2, k3, k4 = jax.random.split(root, 5)

    params = make_params(kp, Cin, Cout)
    target_feats = jax.random.normal(k1, (B, Cin, H, W), jnp.float32)
    source_feats = jax.random.normal(k2, (B, Cin, H, W), jnp.float32)
    # aux probs: per-class distribution over spatial locations
    target_aux_prob = jax.nn.softmax(
        jax.random.normal(k3, (B, K, N), jnp.float32), axis=-1)
    source_aux_prob = jax.nn.softmax(
        jax.random.normal(k4, (B, K, N), jnp.float32), axis=-1)

    # tile_n=256 -> 4 spatial tiles: exercises the split reduction (2 partials),
    # the ctx accumulator across tiles, and the multi-tile attention path.
    out = label_context_attention(target_feats, source_feats,
                                  target_aux_prob, source_aux_prob, params,
                                  context_type="tlabel", tile_n=256)
    out = jax.block_until_ready(out)
    assert out.shape == (B, Cout, H, W)

    # f32 reference computed from the same bf16-rounded operands the kernel uses
    # on its bf16 paths (features/prob and the query weights).
    bf = lambda x: x.astype(jnp.bfloat16).astype(jnp.float32)
    params_ref = dict(params)
    params_ref["q1wT"] = bf(params["q1wT"])
    params_ref["q2wT"] = bf(params["q2wT"])
    ref = reference(bf(target_feats), bf(source_feats), bf(target_aux_prob),
                    params_ref)

    out_f32 = out.astype(jnp.float32)
    max_err = float(jnp.max(jnp.abs(out_f32 - ref)))
    assert jnp.allclose(out_f32, ref, atol=3e-2, rtol=3e-2), \
        f"mismatch vs reference (max abs err {max_err})"

    print("KERNEL_OK")
</pallas_src>

<mosaic_0001>
module attributes {stable_mosaic.version = 11 : i64} {
  func.func @_context_kernel(%arg0: i32, %arg1: i32, %arg2: i32, %arg3: memref<1x4x256xf32, #tpu.memory_space<vmem>>, %arg4: memref<1x256x8xbf16, #tpu.memory_space<vmem>>, %arg5: memref<1x1x4x8xf32, #tpu.memory_space<vmem>>) attributes {dimension_semantics = [#tpu.dimension_semantics<parallel>, #tpu.dimension_semantics<parallel>, #tpu.dimension_semantics<arbitrary>], iteration_bounds = array<i64: 2, 2, 2>, scalar_prefetch = 0 : i64, scratch_operands = 0 : i64, tpu.core_type = #tpu.core_type<tc>, window_params = [{transform_indices = @transform_0, window_bounds = array<i64: 1, 4, 256>}, {transform_indices = @transform_1, window_bounds = array<i64: 1, 256, 8>}, {transform_indices = @transform_2, window_bounds = array<i64: 1, 1, 4, 8>}]} {
    %c0_i32 = arith.constant 0 : i32
    %0 = arith.cmpi eq, %arg2, %c0_i32 : i32
    %1 = arith.extui %0 : i1 to i32
    %c0_i32_0 = arith.constant 0 : i32
    %2 = arith.cmpi ne, %1, %c0_i32_0 : i32
    scf.if %2 {
      %cst_14 = arith.constant 0.000000e+00 : f32
      %15 = vector.broadcast %cst_14 : f32 to vector<1x1x4x8xf32>
      %c0_15 = arith.constant 0 : index
      %c0_16 = arith.constant 0 : index
      %c0_17 = arith.constant 0 : index
      %c0_18 = arith.constant 0 : index
      %16 = vector.load %arg5[%c0_15, %c0_16, %c0_17, %c0_18] : memref<1x1x4x8xf32, #tpu.memory_space<vmem>>, vector<1x1x4x8xf32>
      tpu.vector_store %arg5[%c0_15, %c0_16, %c0_17, %c0_18], %15 {strides = array<i32>} : memref<1x1x4x8xf32, #tpu.memory_space<vmem>>, vector<1x1x4x8xf32>,
    } else {
    }
    %c0 = arith.constant 0 : index
    %c0_1 = arith.constant 0 : index
    %c0_2 = arith.constant 0 : index
    %3 = vector.load %arg3[%c0, %c0_1, %c0_2] : memref<1x4x256xf32, #tpu.memory_space<vmem>>, vector<1x4x256xf32>
    %4 = vector.shape_cast %3 : vector<1x4x256xf32> to vector<4x256xf32>
    %5 = arith.truncf %4 : vector<4x256xf32> to vector<4x256xbf16>
    %c0_3 = arith.constant 0 : index
    %c0_4 = arith.constant 0 : index
    %c0_5 = arith.constant 0 : index
    %6 = vector.load %arg4[%c0_3, %c0_4, %c0_5] : memref<1x256x8xbf16, #tpu.memory_space<vmem>>, vector<1x256x8xbf16>
    %7 = vector.shape_cast %6 : vector<1x256x8xbf16> to vector<256x8xbf16>
    %c0_6 = arith.constant 0 : index
    %c0_7 = arith.constant 0 : index
    %c0_8 = arith.constant 0 : index
    %c0_9 = arith.constant 0 : index
    %8 = vector.load %arg5[%c0_6, %c0_7, %c0_8, %c0_9] : memref<1x1x4x8xf32, #tpu.memory_space<vmem>>, vector<1x1x4x8xf32>
    %9 = vector.shape_cast %8 : vector<1x1x4x8xf32> to vector<4x8xf32>
    %cst = arith.constant dense<0.000000e+00> : vector<4x8xf32>
    %10 = tpu.matmul %5, %7, %cst {dimension_numbers = #tpu.dot_dimension_numbers<[1], [0], [0], [1], [0, 0, 1, 1], [], []>} : vector<4x256xbf16>, vector<256x8xbf16>, vector<4x8xf32> -> vector<4x8xf32>
    %11 = arith.addf %9, %10 : vector<4x8xf32>
    %c0_10 = arith.constant 0 : index
    %c0_11 = arith.constant 0 : index
    %c0_12 = arith.constant 0 : index
    %c0_13 = arith.constant 0 : index
    %12 = vector.load %arg5[%c0_10, %c0_11, %c0_12, %c0_13] : memref<1x1x4x8xf32, #tpu.memory_space<vmem>>, vector<1x1x4x8xf32>
    %13 = vector.shape_cast %12 : vector<1x1x4x8xf32> to vector<4x8xf32>
    %14 = vector.shape_cast %11 : vector<4x8xf32> to vector<1x1x4x8xf32>
    tpu.vector_store %arg5[%c0_10, %c0_11, %c0_12, %c0_13], %14 {strides = array<i32>} : memref<1x1x4x8xf32, #tpu.memory_space<vmem>>, vector<1x1x4x8xf32>,
    return
  }
  func.func @transform_0(%arg0: i32, %arg1: i32, %arg2: i32) -> (i32, i32, i32) {
    %c2_i32 = arith.constant 2 : i32
    %0 = arith.muli %arg0, %c2_i32 : i32
    %1 = arith.addi %0, %arg2 : i32
    %c0_i32 = arith.constant 0 : i32
    %c0_i32_0 = arith.constant 0 : i32
    return %arg1, %c0_i32, %1 : i32, i32, i32
  }
  func.func @transform_1(%arg0: i32, %arg1: i32, %arg2: i32) -> (i32, i32, i32) {
    %c2_i32 = arith.constant 2 : i32
    %0 = arith.muli %arg0, %c2_i32 : i32
    %1 = arith.addi %0, %arg2 : i32
    %c0_i32 = arith.constant 0 : i32
    %c0_i32_0 = arith.constant 0 : i32
    return %arg1, %1, %c0_i32 : i32, i32, i32
  }
  func.func @transform_2(%arg0: i32, %arg1: i32, %arg2: i32) -> (i32, i32, i32, i32) {
    %c0_i32 = arith.constant 0 : i32
    %c0_i32_0 = arith.constant 0 : i32
    %c0_i32_1 = arith.constant 0 : i32
    return %arg0, %arg1, %c0_i32, %c0_i32_0 : i32, i32, i32, i32
  }
}

</mosaic_0001>

<bundles_post_ra>
// kernel: tpu_custom_call.1
= control target key start
LH: loop header
LB: loop body
LE: loop exit
PB: predicated region body
PF: predicated region fallthrough
CT: control target
= control target key end

     0   :  { %7 = vsyncpa [#allocation3], 0  ;;  %s1033_s0 = inlined_call_operand.vmem [shape: f32[2,4,1024], index: 0, kind: input, shape index: {}]   ;;  %s1034_s1 = inlined_call_operand.vmem [shape: bf16[2,1024,8], index: 1, kind: input, shape index: {}]   ;;  %s1035_s2 = inlined_call_operand.hbm [shape: f32[2,2,4,8], index: 2, kind: output, shape index: {}]  }
   0x1   :  { %9 = vsyncpa [#allocation3 + $0x1], 0  ;;  %s856_s9 = smov 0   ;;  %s858_s10 = smov 0  }
   0x2   :  { %s860_s11 = smov 0   ;;  %s862_s12 = smov 0  }
   0x3   :  { %s864_s13 = smov 0   ;;  %s866_s14 = smov 0  }
   0x4   :  { %s868_s15 = smov 0   ;;  %s870_s16 = smov 0  }
   0x5   :  { %s872_s17 = smov 0   ;;  %s874_s18 = smov 0  }
   0x6 LB: > { %1042 = sst [smem:[#allocation5_spill]] %s830_s16  ;;  %s536_s19 = sadd.s32 4294967295, %s838_s18   ;;  %s838_s18 = sphi %s874_s18, %s15_s18   ;;  %s834_s17 = sphi %s872_s17, %s1055_s17   ;;  %s830_s16 = sphi %s870_s16, %s1054_s16   ;;  %s826_s15 = sphi %s868_s15, %s1060_s15   ;;  %s822_s14 = sphi %s866_s14, %s1052_s14   ;;  %s818_s13 = sphi %s864_s13, %s1051_s13   ;;  %s814_s12 = sphi %s862_s12, %s1059_s12   ;;  %s810_s11 = sphi %s860_s11, %s1058_s11   ;;  %s806_s10 = sphi %s858_s10, %s1057_s10   ;;  %s802_s9 = sphi %s856_s9, %s1056_s9  }
   0x7   : > { %1043 = sst [smem:[#allocation6_spill]] %s834_s17  ;;  %s537_s20 = sadd.s32 4294967294, %s838_s18  }
   0x8   : > { %s27_s21 = sadd.s32 1, %s826_s15  ;;  %s30_s22 = sadd.s32 1, %s830_s16 }
   0x9   : > { %p28_p0 = scmp.ge.s32.totalorder %s27_s21, 2  ;;  %s34_s23 = sadd.s32 1, %s834_s17 }
   0xa   : > { %p117_p1 = scmp.ne.s32.totalorder %s810_s11, %s806_s10  ;;  %p118_p2 = scmp.eq.s32.totalorder %s536_s19, 7 }
   0xb   : > { %s1062_s21 = smov (%p28_p0, %s27_s21), 0  ;;  %s1064_s22 = smov (!%p28_p0, %s30_s22), %s830_s16 }
   0xc   : > { %1044 = sst [smem:[#allocation7_spill]] %s1062_s21  ;;  %p123_p3 = scmp.ne.s32.totalorder %s806_s10, %s802_s9 }
   0xd   : > { %p32_p4 = scmp.ge.s32.totalorder %s1064_s22, 2  ;;  %p124_p5 = scmp.eq.s32.totalorder %s537_s20, 7 }
   0xe   : > { %p918_p6 = por %p118_p2, %p117_p1  ;;  %p544_p8 = scmp.ge.s32.totalorder %s838_s18, 1 }
   0xf   : > { %s1066_s22 = smov (%p32_p4, %s1064_s22), 0  ;;  %s1068_s23 = smov (!%p32_p4, %s34_s23), %s834_s17 }
  0x10   : > { %1046 = sst [smem:[#allocation8_spill]] %s1066_s22  ;;  %p925_p7 = por %p124_p5, %p123_p3 }
  0x11   : > { %p36_p9 = scmp.ge.s32.totalorder %s1068_s23, 2  ;;  %p176_p10 = scmp.lt.s32.totalorder %s838_s18, 9 }
  0x12   : > { %s103_s26 = ssub.s32 %s830_s16, %s1066_s22  ;;  %s107_s29 = sadd.s32 1, %s810_s11 }
  0x13   : > { %s1070_s23 = smov (%p36_p9, %s1068_s23), 0  ;;  %p177_p11 = pnand %p544_p8, %p176_p10 }
  0x14   : > { %1048 = sst [smem:[#allocation9_spill]] %s1070_s23  ;;  %s102_s27 = ssub.s32 %s834_s17, %s1070_s23 }
  0x15   : > { %s104_s28 = sor.u32 %s103_s26, %s102_s27  ;;  %180 = sbr.rel (%p177_p11) target bundleno = 210 (0xd2), region = 28 }
  0x16   : > { %p105_p12 = scmp.eq.s32.totalorder %s104_s28, 0  ;;  %s1038_s3 = sand.u32 (!%p177_p11), 1, %s806_s10  }
  0x17   : > { %s1040_s4 = sshll.u32 (!%p177_p11), %s822_s14, 1  ;;  %s545_s5 = sshll.u32 (!%p177_p11), %s1038_s3, 2 }
  0x18   : > { %s939_s30 = scalar_select %p105_p12, %s810_s11, %s107_s29  }
  0x19   : > { %s216_s6 = sadd.s32 (!%p177_p11), %s814_s12, %s1040_s4  ;;  %p218_p13 = scmp.lt.s32.totalorder (!%p177_p11), %s818_s13, 1 }
  0x1a   : > { %s547_s7 = sshll.u32 %s216_s6, 1  ;;  %s551_s8 = sshll.u32 %s216_s6, 5 }
  0x1b   : > { %p220_p0 = scmp.lt.s32.totalorder %s547_s7, 7  ;;  %p234_p1 = scmp.lt.s32.totalorder %s551_s8, 127 }
  0x1c   : > { %s219_s19 = scalar_select %p218_p13, %s818_s13, 1 }
  0x1d   : > { %s1072_s7 = smov (!%p220_p0, %s547_s7), 7  ;;  %s1074_s8 = smov (!%p234_p1, %s551_s8), 127 }
  0x1e   : > { %s548_s20 = sshll.u32 %s219_s19, 3  ;;  %s552_s22 = sshll.u32 %s219_s19, 7 }
  0x1f   : > { %s223_s26 = sadd.s32 %s548_s20, %s1072_s7  ;;  %s237_s21 = sadd.s32 %s552_s22, %s1074_s8 }
  0x20   : > { %s549_s27 = sshll.u32 %s223_s26, 2  ;;  %s553_s3 = sshll.u32 %s237_s21, 2 }
  0x21   : > { %s225_s23 = scalar_lea.vmem %s1033_s0, %s549_s27  ;;  %s956_s16 = scalar_lea.vmem %s1034_s1, %s553_s3 }
  0x22   : > { %s958_s6 = scalar_lea.vmem [#allocation2], %s545_s5  ;;  %p554_p2 = scmp.ne.s32.totalorder %s814_s12, 0 }
  0x24   : > { %246 = sbr.rel (%p554_p2) target bundleno = 43 (0x2b), region = 32 }
  0x29   : > { %vm247_vm0 = vcmask 60416   ;;  %v840_v0 = vmov 0.0  }
  0x2a   : > { %248 = vst.msk [vmem:[%s958_s6] sm:$0xf] %vm247_vm0, %v840_v0 }
  0x2b PF: > { %v631_v1 = vld [vmem:[%s956_s16 + $0x38] sm:$0xff]  ;;  %v630_v3 = vld [vmem:[%s956_s16 + $0x30] sm:$0xff]  ;;  %v249_v5 = vld [vmem:[%s225_s23] sm:$0xff]  ;;  %s1049_s12 = sshll.u32 %s822_s14, 1  ;;  %s431_s3 = sshll.u32 %s958_s6, 4  ;;  %vm414_vm1 = vcmask 60416   ;;  %s432_s3 = int_to_ptr.vmem [resolvable:$true] %s431_s3 }
  0x2c   : > { %v639_v2 = vld [vmem:[%s956_s16 + $0x78] sm:$0xff]  ;;  %387 = vmatpush.bf16.msra.mxu0 %v631_v1  ;;  %v638_v4 = vld [vmem:[%s956_s16 + $0x70] sm:$0xff]  ;;  %v629_v6 = vld [vmem:[%s956_s16 + $0x28] sm:$0xff]  ;;  %251 = vst [vmem:[#allocation1] ss:$2 sm:$0xff] %v249_v5  ;;  %s427_s17 = sadd.s32 %s818_s13, %s1049_s12  ;;  %s1050_s5 = sand.u32 1, %s806_s10  }
  0x2d   : > { %400 = vmatpush.bf16.msra.mxu1 %v639_v2  ;;  %v637_v7 = vld [vmem:[%s956_s16 + $0x68] sm:$0xff]  ;;  %v628_v8 = vld [vmem:[%s956_s16 + $0x20] sm:$0xff]  ;;  %v627_v10 = vld [vmem:[%s956_s16 + $0x18] sm:$0xff]  ;;  %s621_s21 = sshll.u32 %s427_s17, 2  ;;  %s417_s14 = scalar_lea.sflag [#allocation3], %s1050_s5 }
  0x2e   : > { %v636_v9 = vld [vmem:[%s956_s16 + $0x60] sm:$0xff]  ;;  %v635_v11 = vld [vmem:[%s956_s16 + $0x58] sm:$0xff]  ;;  %v626_v12 = vld [vmem:[%s956_s16 + $0x10] sm:$0xff]  ;;  %s748_s20 = scalar_lea.hbm %s1035_s2, 16 }
  0x2f   : > { %v634_v13 = vld [vmem:[%s956_s16 + $0x50] sm:$0xff]  ;;  %v625_v14 = vld [vmem:[%s956_s16 + $0x8] sm:$0xff]  ;;  %v624_v16 = vld [vmem:[%s956_s16] sm:$0xff] }
  0x30   : > { %388 = vmatpush.bf16.msra.mxu0 %v630_v3  ;;  %v633_v15 = vld [vmem:[%s956_s16 + $0x48] sm:$0xff]  ;;  %v632_v17 = vld [vmem:[%s956_s16 + $0x40] sm:$0xff]  ;;  %s429_s16 = scalar_lea.hbm %s1035_s2, %s621_s21 }
  0x31   : > { %401 = vmatpush.bf16.msra.mxu1 %v638_v4  ;;  %v290_v23 = vld [vmem:[%s958_s6] sm:$0xf]  ;;  %s433_s4 = sshll.u32 %s429_s16, 4  ;;  %s434_s4 = int_to_ptr.hbm [resolvable:$true] %s433_s4 }
  0x32   : > { %s742_s13 = sshra.s32 %s434_s4, 4  ;;  %s743_s13 = int_to_ptr.hbm [resolvable:$true] %s742_s13 }
  0x33   : > { %v252_v18 = vld.sshfl [vmem:[#allocation1] sm:$0xff pattern:$0x75316420]  ;;  %v253_v19 = vld.sshfl [vmem:[#allocation1 + $0x8] sm:$0xff pattern:$0x75316420]  ;;  %p749_p8 = scmp.lt.s32.totalorder %s743_s13, %s1035_s2 }
  0x34   : > { %389 = vmatpush.bf16.msra.mxu0 %v629_v6  ;;  %v256_v20 = vpack.c.bf16 %v252_v18, %v252_v18  ;;  %v257_v21 = vpack.c.bf16 %v253_v19, %v253_v19  ;;  %s744_s7 = scalar_lea.hbm %s743_s13, 4 }
  0x35   : > { %402 = vmatpush.bf16.msra.mxu1 %v637_v7  ;;  %p745_p3 = scmp.ne.s32.totalorder %s743_s13, %s744_s7  ;;  %p750_p9 = scmp.lt.s32.totalorder %s748_s20, %s744_s7 }
  0x37   : > { %p746_p4 = pnand %p745_p3, %p918_p6  ;;  %p751_p10 = por %p750_p9, %p749_p8 }
  0x38   : > { %390 = vmatpush.bf16.msra.mxu0 %v628_v8 }
  0x39   : > { %403 = vmatpush.bf16.msra.mxu1 %v636_v9  ;;  %p747_p5 = pneg %p746_p4 }
  0x3b   : > { %p752_p11 = pnand %p751_p10, %p747_p5 }
  0x3c   : > { %391 = vmatpush.bf16.msra.mxu0 %v627_v10 }
  0x3d   : > { %404 = vmatpush.bf16.msra.mxu1 %v635_v11 }
  0x40   : > { %392 = vmatpush.bf16.msra.mxu0 %v626_v12 }
  0x41   : > { %405 = vmatpush.bf16.msra.mxu1 %v634_v13 }
  0x44   : > { %393 = vmatpush.bf16.msra.mxu0 %v625_v14 }
  0x45   : > { %406 = vmatpush.bf16.msra.mxu1 %v633_v15 }
  0x48   : > { %394 = vmatpush.bf16.msra.mxu0 %v624_v16 }
  0x49   : > { %407 = vmatpush.bf16.msra.mxu1 %v632_v17 }
  0x4b   : > { %395 = vmatmul.bf16.vlgmr.msra.gmra.mxu0 %v256_v20 }
  0x4c   : > { %408 = vmatmul.bf16.vlgmr.msra.gmra.mxu1 %v257_v21 }
  0xc8   : > { %v396_v22 = vpop.f32.mrf.mxu0 }
  0xc9   : > { %v409_v24 = vpop.f32.mrf.mxu1 }
  0xca   : > { %v410_v25 = vadd.f32 %v409_v24, %v396_v22 }
  0xcc   : > { %v413_v26 = vadd.f32 %v410_v25, %v290_v23 }
  0xce   : > { %415 = vst.msk [vmem:[%s958_s6] sm:$0xf] %vm414_vm1, %v413_v26 }
  0xcf   : > { %755 = shalt.err (!%p752_p11)
}
  0xd0   : > { %640 = dma.vmem_to_hbm [thread:$0]  (%p918_p6), %s432_s3, 64, %s434_s4, %s417_s14   ;;  %v398_v27 = vpop.f32.mrf.mxu0 }
  0xd1   : > { %v411_v28 = vpop.f32.mrf.mxu1 }
  0xd2 PF: > { %p646_p12 = scmp.ge.s32.totalorder %s838_s18, 2  ;;  %s445_s28 = sand.u32 1, %s802_s9  }
  0xd3   : > { %s446_s29 = scalar_lea.sflag [#allocation3], %s445_s28 }
  0xd4   : > { %p643_p13 = pnand %p646_p12, %p925_p7 }
  0xd6   : > { %p644_p0 = pneg %p643_p13 }
  0xd8   : > { %797 = dma.done.wait (%p644_p0), %s446_s29, 64  }
  0xd9   : > { %799 = vsyncadd (%p644_p0), %s446_s29, 4294967232  ;;  %s15_s18 = sadd.s32 1, %s838_s18   ;;  %s1051_s13 = sld [smem:[#allocation5_spill]] }
  0xda   : > { %p12_p1 = scmp.ge.s32.totalorder %s15_s18, 10   ;;  %s1052_s14 = sld [smem:[#allocation6_spill]] }
  0xdb   : > { %s1053_s24 = sld [smem:[#allocation7_spill]]  ;;  %s1056_s9 = smov %s806_s10 }
  0xdc   : > { %s1054_s16 = sld [smem:[#allocation8_spill]]  ;;  %s1057_s10 = smov %s810_s11 }
  0xdd   : > { %s1055_s17 = sld [smem:[#allocation9_spill]]  ;;  %s1058_s11 = smov %s939_s30 }
  0xde   : > { %s1059_s12 = smov %s826_s15  ;;  %14 = sbr.rel (!%p12_p1) target bundleno = 6 (0x6), region = 70 }
  0xe1   : > { %s1060_s15 = smov %s1053_s24 }
  0xe3   :  { %452 = vsyncpa [#allocation3], 1 }
  0xe4   :  { %454 = vsyncpa [#allocation3 + $0x1], 1 }

</bundles_post_ra>
